<compile_context>
chip_gen: v7x
topology: tpu7x:2x2x1
jax: 0.10.0
libtpu: 0.0.40
codegen_flags: <defaults>
</compile_context>

<pallas_src>
import functools

import jax
import jax.numpy as jnp
from jax.experimental import pallas as pl
from jax.experimental.pallas import tpu as pltpu


def _round_up(n, m):
    return ((n + m - 1) // m) * m


def linear_kernel(x_ref, w_ref, b_ref, o_ref, *, pack, feat):
    """One batch tile of y = x @ W^T + b on the VPU.

    x_ref: (TB, pack*feat) VMEM tile; each lane-row holds `pack` original rows.
    w_ref: (1, pack*feat)  VMEM, weight tiled `pack` times, resident across grid.
    b_ref: (1, 1)          SMEM scalar bias.
    o_ref: (TB, pack)      VMEM output block (column p = dot of packed row p).
    """
    prod = x_ref[...] * w_ref[...]          # VPU elementwise, f32
    b = b_ref[0, 0]
    # Segmented cross-lane reduce (XLU); `pack` is a small static constant so
    # this unrolls.  Hidden under the HBM DMA for this bandwidth-bound kernel.
    for p in range(pack):
        seg = prod[:, p * feat:(p + 1) * feat]                  # (TB, feat)
        col = jnp.sum(seg, axis=1, keepdims=True) + b           # (TB, 1) f32
        o_ref[:, p:p + 1] = col.astype(o_ref.dtype)


def _tile_budget_bytes():
    """Generation-aware budget for one x tile (+ matching vmem limit)."""
    cap = None
    try:
        cap = getattr(pltpu.get_tpu_info(), "vmem_capacity_bytes", None)
    except Exception:
        cap = None
    if not cap:
        cap = 64 * 1024 * 1024          # conservative default (v7x per-TC VMEM)
    # ~8 MiB tiles on 128 MiB parts (v5e/v6e), ~5 MiB on v7x's 64 MiB per TC.
    budget = int(max(4 * 1024 * 1024, min(8 * 1024 * 1024, cap // 12)))
    # Headroom for: 2x double-buffered x tile + elementwise temp + weight + out.
    vmem_limit = int(min(cap, 6 * budget))
    return budget, vmem_limit


def linear_regression_forward(x, weight, bias):
    """Pallas TPU forward of torch.nn.Linear(input_dim, 1): (B, D) -> (B, 1)."""
    B, D = x.shape
    assert weight.shape == (1, D) and bias.shape == (1,)
    itemsize = jnp.dtype(x.dtype).itemsize

    # Pack 128//D original rows per lane-row when D divides 128: removes the
    # (128/D)x lane padding in VMEM / DMA / VPU for small D (D=32 -> 4x).
    if 0 < D < 128 and 128 % D == 0 and B % (128 // D) == 0:
        pack = 128 // D
    else:
        pack = 1
    num_rows = B // pack
    width = pack * D
    x2 = x.reshape(num_rows, width) if pack > 1 else x           # layout plumbing
    w2 = jnp.tile(weight, (1, pack)) if pack > 1 else weight     # (1, width)

    budget, vmem_limit = _tile_budget_bytes()
    row_bytes = _round_up(width, 128) * itemsize                 # lane-padded width
    rows = max(8, (budget // row_bytes) // 8 * 8)
    # TODO(synk): for extreme input_dim (where even an 8-row tile overflows the
    # budget) add a reduction grid axis over D with an f32 accumulator.
    if num_rows <= rows:
        tb = num_rows                    # single block == full array (always legal)
    else:
        tb = rows                        # multiple of 8; tail block masked by Pallas
    grid = (pl.cdiv(num_rows, tb),)      # no wrapper padding / no extra HBM pass

    bias_smem = bias.reshape(1, 1).astype(jnp.float32)
    kernel = functools.partial(linear_kernel, pack=pack, feat=D)

    out2 = pl.pallas_call(
        kernel,
        out_shape=jax.ShapeDtypeStruct((num_rows, pack), x.dtype),
        grid_spec=pltpu.PrefetchScalarGridSpec(
            num_scalar_prefetch=0,
            grid=grid,
            in_specs=[
                # x: one (tb, width) tile per grid step -> double-buffered DMA.
                pl.BlockSpec((tb, width), lambda i: (i, 0)),
                # weight: constant index_map -> stays resident in VMEM.
                pl.BlockSpec((1, width), lambda i: (0, 0)),
                # bias: single scalar in SMEM.
                pl.BlockSpec(memory_space=pltpu.MemorySpace.SMEM),
            ],
            out_specs=pl.BlockSpec((tb, pack), lambda i: (i, 0)),
        ),
        compiler_params=pltpu.CompilerParams(
            # "parallel" lets the batch-tile axis shard across v7x's 2 TCs;
            # no-op (and harmless) on single-TC v5e/v6e.
            dimension_semantics=("parallel",),
            vmem_limit_bytes=vmem_limit,
        ),
    )(x2, w2, bias_smem)

    # Free layout plumbing: (num_rows, pack) -> (B, 1) in original row order.
    return out2.reshape(B, 1)


if __name__ == "__main__":
    key = jax.random.PRNGKey(0)
    kx, kw, kb = jax.random.split(key, 3)

    # Shapes consistent with the module: batch=8, input_dim=32.
    batch, input_dim = 8, 32
    x = jax.random.normal(kx, (batch, input_dim), dtype=jnp.float32)
    weight = jax.random.normal(kw, (1, input_dim), dtype=jnp.float32) * 0.1
    bias = jax.random.normal(kb, (1,), dtype=jnp.float32) * 0.1

    def ref_fn(a, w, b):
        # Pure-f32 VPU reference (avoids MXU default-precision ambiguity).
        return jnp.sum(a * w, axis=1, keepdims=True) + b

    out = jax.block_until_ready(linear_regression_forward(x, weight, bias))
    assert out.shape == (batch, 1)
    assert jnp.allclose(out, ref_fn(x, weight, bias), atol=1e-5, rtol=1e-5)

    # Batch not divisible by the lane-pack factor -> unpacked fallback path.
    x2 = jax.random.normal(kx, (10, input_dim), dtype=jnp.float32)
    out2 = jax.block_until_ready(linear_regression_forward(x2, weight, bias))
    assert jnp.allclose(out2, ref_fn(x2, weight, bias), atol=1e-5, rtol=1e-5)

    # Multi-tile pipelined path with a partial (masked) tail block, no jnp.pad.
    x3 = jax.random.normal(kx, (70_000, input_dim), dtype=jnp.float32)
    out3 = jax.block_until_ready(linear_regression_forward(x3, weight, bias))
    assert jnp.allclose(out3, ref_fn(x3, weight, bias), atol=1e-5, rtol=1e-5)

    # Wide-feature path (D >= 128, no lane packing).
    d2 = 200
    xw = jax.random.normal(kx, (64, d2), dtype=jnp.float32)
    ww = jax.random.normal(kw, (1, d2), dtype=jnp.float32) * 0.1
    outw = jax.block_until_ready(linear_regression_forward(xw, ww, bias))
    assert jnp.allclose(outw, ref_fn(xw, ww, bias), atol=1e-5, rtol=1e-5)

    print("KERNEL_OK")
</pallas_src>

<mosaic_0001>
module attributes {stable_mosaic.version = 11 : i64} {
  func.func @linear_kernel(%arg0: i32, %arg1: memref<2x128xf32, #tpu.memory_space<vmem>>, %arg2: memref<1x128xf32, #tpu.memory_space<vmem>>, %arg3: memref<1x1xf32, #tpu.memory_space<smem>>, %arg4: memref<2x4xf32, #tpu.memory_space<vmem>>) attributes {dimension_semantics = [#tpu.dimension_semantics<parallel>], iteration_bounds = array<i64: 1>, scalar_prefetch = 0 : i64, scratch_operands = 0 : i64, tpu.core_type = #tpu.core_type<tc>, window_params = [{transform_indices = @transform_0, window_bounds = array<i64: 2, 128>}, {pipeline_mode = #tpu.pipeline_mode<synchronous>, transform_indices = @transform_1, window_bounds = array<i64: 1, 128>}, {transform_indices = @transform_2, window_bounds = array<i64: 1, 1>}, {transform_indices = @transform_3, window_bounds = array<i64: 2, 4>}]} {
    %c0 = arith.constant 0 : index
    %c0_0 = arith.constant 0 : index
    %0 = vector.load %arg1[%c0, %c0_0] : memref<2x128xf32, #tpu.memory_space<vmem>>, vector<2x128xf32>
    %c0_1 = arith.constant 0 : index
    %c0_2 = arith.constant 0 : index
    %1 = vector.load %arg2[%c0_1, %c0_2] : memref<1x128xf32, #tpu.memory_space<vmem>>, vector<1x128xf32>
    %2 = vector.broadcast %1 : vector<1x128xf32> to vector<2x128xf32>
    %3 = arith.mulf %0, %2 : vector<2x128xf32>
    %c0_3 = arith.constant 0 : index
    %c0_4 = arith.constant 0 : index
    %4 = memref.load %arg3[%c0_3, %c0_4] : memref<1x1xf32, #tpu.memory_space<smem>>
    %5 = vector.extract_strided_slice %3 {offsets = [0, 0], sizes = [2, 32], strides = [1, 1]} : vector<2x128xf32> to vector<2x32xf32>
    %cst = arith.constant dense<0.000000e+00> : vector<2xf32>
    %6 = vector.multi_reduction <add>, %5, %cst [1] : vector<2x32xf32> to vector<2xf32>
    %7 = vector.shape_cast %6 : vector<2xf32> to vector<2x1xf32>
    %8 = vector.broadcast %4 : f32 to vector<2x1xf32>
    %9 = arith.addf %7, %8 : vector<2x1xf32>
    %c0_5 = arith.constant 0 : index
    %c0_6 = arith.constant 0 : index
    %10 = vector.load %arg4[%c0_5, %c0_6] : memref<2x4xf32, #tpu.memory_space<vmem>>, vector<2x1xf32>
    tpu.vector_store %arg4[%c0_5, %c0_6], %9 {strides = array<i32>} : memref<2x4xf32, #tpu.memory_space<vmem>>, vector<2x1xf32>,
    %11 = vector.extract_strided_slice %3 {offsets = [0, 32], sizes = [2, 32], strides = [1, 1]} : vector<2x128xf32> to vector<2x32xf32>
    %cst_7 = arith.constant dense<0.000000e+00> : vector<2xf32>
    %12 = vector.multi_reduction <add>, %11, %cst_7 [1] : vector<2x32xf32> to vector<2xf32>
    %13 = vector.shape_cast %12 : vector<2xf32> to vector<2x1xf32>
    %14 = vector.broadcast %4 : f32 to vector<2x1xf32>
    %15 = arith.addf %13, %14 : vector<2x1xf32>
    %c0_8 = arith.constant 0 : index
    %c1 = arith.constant 1 : index
    %16 = vector.load %arg4[%c0_8, %c1] : memref<2x4xf32, #tpu.memory_space<vmem>>, vector<2x1xf32>
    tpu.vector_store %arg4[%c0_8, %c1], %15 {strides = array<i32>} : memref<2x4xf32, #tpu.memory_space<vmem>>, vector<2x1xf32>,
    %17 = vector.extract_strided_slice %3 {offsets = [0, 64], sizes = [2, 32], strides = [1, 1]} : vector<2x128xf32> to vector<2x32xf32>
    %cst_9 = arith.constant dense<0.000000e+00> : vector<2xf32>
    %18 = vector.multi_reduction <add>, %17, %cst_9 [1] : vector<2x32xf32> to vector<2xf32>
    %19 = vector.shape_cast %18 : vector<2xf32> to vector<2x1xf32>
    %20 = vector.broadcast %4 : f32 to vector<2x1xf32>
    %21 = arith.addf %19, %20 : vector<2x1xf32>
    %c0_10 = arith.constant 0 : index
    %c2 = arith.constant 2 : index
    %22 = vector.load %arg4[%c0_10, %c2] : memref<2x4xf32, #tpu.memory_space<vmem>>, vector<2x1xf32>
    tpu.vector_store %arg4[%c0_10, %c2], %21 {strides = array<i32>} : memref<2x4xf32, #tpu.memory_space<vmem>>, vector<2x1xf32>,
    %23 = vector.extract_strided_slice %3 {offsets = [0, 96], sizes = [2, 32], strides = [1, 1]} : vector<2x128xf32> to vector<2x32xf32>
    %cst_11 = arith.constant dense<0.000000e+00> : vector<2xf32>
    %24 = vector.multi_reduction <add>, %23, %cst_11 [1] : vector<2x32xf32> to vector<2xf32>
    %25 = vector.shape_cast %24 : vector<2xf32> to vector<2x1xf32>
    %26 = vector.broadcast %4 : f32 to vector<2x1xf32>
    %27 = arith.addf %25, %26 : vector<2x1xf32>
    %c0_12 = arith.constant 0 : index
    %c3 = arith.constant 3 : index
    %28 = vector.load %arg4[%c0_12, %c3] : memref<2x4xf32, #tpu.memory_space<vmem>>, vector<2x1xf32>
    tpu.vector_store %arg4[%c0_12, %c3], %27 {strides = array<i32>} : memref<2x4xf32, #tpu.memory_space<vmem>>, vector<2x1xf32>,
    return
  }
  func.func @transform_0(%arg0: i32) -> (i32, i32) {
    %c0_i32 = arith.constant 0 : i32
    %c0_i32_0 = arith.constant 0 : i32
    return %arg0, %c0_i32 : i32, i32
  }
  func.func @transform_1(%arg0: i32) -> (i32, i32) {
    %c0_i32 = arith.constant 0 : i32
    %c0_i32_0 = arith.constant 0 : i32
    %c0_i32_1 = arith.constant 0 : i32
    return %c0_i32, %c0_i32_0 : i32, i32
  }
  func.func @transform_2(%arg0: i32) -> (i32, i32) {
    %c0_i32 = arith.constant 0 : i32
    %c0_i32_0 = arith.constant 0 : i32
    %c0_i32_1 = arith.constant 0 : i32
    return %c0_i32, %c0_i32_0 : i32, i32
  }
  func.func @transform_3(%arg0: i32) -> (i32, i32) {
    %c0_i32 = arith.constant 0 : i32
    %c0_i32_0 = arith.constant 0 : i32
    return %arg0, %c0_i32 : i32, i32
  }
}

</mosaic_0001>

<bundles_post_ra>
// kernel: tpu_custom_call.1
= control target key start
LH: loop header
LB: loop body
LE: loop exit
PB: predicated region body
PF: predicated region fallthrough
CT: control target
= control target key end

     0   :  { %s150_s0 = inlined_call_operand.vmem [shape: f32[2,128], index: 0, kind: input, shape index: {}]   ;;  %s151_s1 = inlined_call_operand.vmem [shape: f32[1,128], index: 1, kind: input, shape index: {}]   ;;  %s152_s2 = inlined_call_operand.<no memory space> [shape: f32[1,1], index: 2, kind: input, shape index: {}]   ;;  %s153_s3 = inlined_call_operand.hbm [shape: f32[2,4], index: 3, kind: output, shape index: {}]  }
   0x1   :  { %v16_v0 = vld [vmem:[%s150_s0] sm:$0x3] }
   0x2   :  { %v76_v1 = vld [vmem:[%s151_s1] ss:$0 sm:$0xff] }
   0x3   :  { %v24_v2 = vmul.f32 %v76_v1, %v16_v0 }
   0x4   :  { %9 = vsyncpa [#allocation4], 0  ;;  %s105_s16 = smov 96   ;;  %s106_s17 = smov 32   ;;  %vm26_vm0 = vcmask 254976   ;;  %v30_v10 = vstv %s152_s2  ;;  %vm32_vm1 = vcmask 1024  }
   0x5   :  { %35 = vrot.lane.b32.xlu0 %v24_v2, %s105_s16  ;;  %53 = vrot.lane.b32.xlu1 %v24_v2, %s106_s17  ;;  %s107_s18 = smov 64   ;;  %v27_v3 = vsel %vm26_vm0, %v24_v2, 0.0  ;;  %vm42_vm2 = vcmask 9224   ;;  %s108_s19 = smov [#allocation3]   ;;  %vm51_vm3 = vcmask 17424   ;;  %vm60_vm4 = vcmask 25624  }
   0x6   :  { %s68_s20 = sshll.u32 %s108_s19, 4  ;;  %s69_s20 = int_to_ptr.vmem [resolvable:$true] %s68_s20 }
   0x7   :  { %s81_s2 = scalar_lea.vmem %s69_s20, 32  ;;  %p86_p1 = scmp.lt.s32.totalorder %s69_s20, %s69_s20 }
   0x8   :  { %p82_p0 = scmp.ne.s32.totalorder %s69_s20, %s81_s2  ;;  %p87_p2 = scmp.lt.s32.totalorder %s81_s2, %s81_s2 }
   0x9   :  { %44 = vrot.lane.b32.xlu0 %v24_v2, %s107_s18 }
   0xa   :  { %p88_p3 = por %p87_p2, %p86_p1 }
   0xc   :  { %p89_p4 = pnand %p88_p3, %p82_p0 }
  0x29   :  { %28 = vadd.xlane.f32.xlu1 %v27_v3 }
  0x77   :  { %v36_v4 = vpop.permute.xlu0 %35  ;;  %v54_v5 = vpop.permute.xlu1 %53 }
  0x78   :  { %v38_v6 = vsel %vm26_vm0, %v36_v4, 0.0  ;;  %v56_v7 = vsel %vm26_vm0, %v54_v5, 0.0 }
  0x79   :  { %39 = vadd.xlane.f32.xlu0 %v38_v6  ;;  %57 = vadd.xlane.f32.xlu1 %v56_v7 }
  0x7b   :  { %v45_v8 = vpop.permute.xlu0 %44 }
  0x7c   :  { %v47_v9 = vsel %vm26_vm0, %v45_v8, 0.0 }
  0x7d   :  { %48 = vadd.xlane.f32.xlu0 %v47_v9 }
  0xb6   :  { %v29_v11 = vpop.xlane.xlu1 %28 }
  0xb7   :  { %v31_v12 = vadd.f32 %v30_v10, %v29_v11 }
  0xb9   :  { %33 = vst.msk [vmem:[#allocation3] sm:$0x3] %vm32_vm1, %v31_v12 }
 0x106   :  { %v40_v13 = vpop.xlane.xlu0 %39  ;;  %v58_v15 = vpop.xlane.xlu1 %57 }
 0x107   :  { %v41_v14 = vadd.f32 %v40_v13, %v30_v10  ;;  %v59_v17 = vadd.f32 %v58_v15, %v30_v10 }
 0x109   :  { %43 = vst.msk [vmem:[#allocation3] sm:$0x3] %vm42_vm2, %v41_v14 }
 0x10a   :  { %v49_v16 = vpop.xlane.xlu0 %48 }
 0x10b   :  { %v50_v18 = vadd.f32 %v49_v16, %v30_v10 }
 0x10d   :  { %52 = vst.msk [vmem:[#allocation3] sm:$0x3] %vm51_vm3, %v50_v18 }
 0x10e   :  { %61 = vst.msk [vmem:[#allocation3] sm:$0x3] %vm60_vm4, %v59_v17 }
 0x10f   :  { %92 = shalt.err (!%p89_p4)
}
 0x110   :  { %s93_s23 = scalar_lea.hbm %s153_s3, 32 }
 0x111   :  { %p94_p5 = scmp.ne.s32.totalorder %s153_s3, %s93_s23  ;;  %p97_p6 = scmp.lt.u32.totalorder %s93_s23, %s153_s3 }
 0x113   :  { %p99_p7 = pnand %p97_p6, %p94_p5 }
 0x115   :  { %102 = shalt.err (!%p99_p7)
}
 0x116   :  { %71 = dma.vmem_to_hbm [thread:$0]  %s69_s20, 32, %s153_s3, [#allocation4]  }
 0x117   :  { %103 = dma.done.wait [#allocation4], 32  }
 0x118   :  { %104 = vsyncadd [#allocation4], 4294967264 }
 0x119   :  { %75 = vsyncpa [#allocation4], 1 }

</bundles_post_ra>
